<compile_context>
chip_gen: v7x
topology: tpu7x:2x2x1
jax: 0.10.0
libtpu: 0.0.40
codegen_flags: <defaults>
</compile_context>

<pallas_src>
import jax
import jax.numpy as jnp
from jax.experimental import pallas as pl
from jax.experimental.pallas import tpu as pltpu

# ----------------------------- config (small shapes) ------------------------
NUM_NODES    = 64     # total nodes in the batched graph (N)
NUM_GRAPHS   = 4      # number of graphs (G)
EMB_DIM      = 128    # emb_dim
NUM_LAYERS   = 5      # num_layers
NUM_TASKS    = 32     # num_tasks
PADDED_TASKS = 128    # lane-dense head / output padding
BN_EPS       = 1e-5

_FLOPS = (2 * NUM_NODES * EMB_DIM
          + 2 * (NUM_LAYERS - 1) * NUM_NODES * EMB_DIM * EMB_DIM
          + 2 * NUM_GRAPHS * NUM_NODES * EMB_DIM
          + 2 * NUM_GRAPHS * EMB_DIM * PADDED_TASKS)
_BYTES = (NUM_NODES * 4                                  # x
          + 2 * EMB_DIM * 4                              # encoder w/b
          + (NUM_LAYERS - 1) * EMB_DIM * EMB_DIM * 2     # hidden weights (bf16)
          + (NUM_LAYERS - 1) * EMB_DIM * 4               # hidden biases (f32)
          + NUM_NODES * 4                                # batch ids
          + EMB_DIM * PADDED_TASKS * 2 + PADDED_TASKS * 4  # head (bf16) + bias
          + NUM_GRAPHS * PADDED_TASKS * 4)               # output


# ----------------------------- fused kernel ----------------------------------
def fused_mlp_kernel(x_ref, we_ref, be_ref, w_ref, b_ref, bid_ref,
                     wh_ref, bh_ref, o_ref):
    # x_ref:   (N, 1) f32        we_ref/be_ref: (1, E) f32
    # w_ref:   (L-1, E, E) bf16  b_ref: (L-1, 1, E) f32   (BatchNorm folded)
    # bid_ref: (1, N) int32
    # wh_ref:  (E, 128) bf16     bh_ref: (1, 128) f32     (last fc + head folded)
    # o_ref:   (G, 128) f32

    # node encoder: outer product via VPU broadcast (avoid a K=1 MXU matmul)
    h = x_ref[...] * we_ref[...] + be_ref[...]                     # (N, E) f32

    # hidden layers 0..L-2 (statically unrolled); bf16 MXU, f32 accumulate,
    # bias-add + relu on the f32 accumulator (v5e-friendly).
    for l in range(NUM_LAYERS - 1):
        z = jnp.dot(h.astype(jnp.bfloat16), w_ref[l],
                    preferred_element_type=jnp.float32)
        h = jnp.maximum(z + b_ref[l], 0.0)                         # (N, E) f32

    # global mean pool BEFORE the (linear, ReLU-free) last layer:
    # build onehot in-kernel, fold 1/counts in via EUP approx reciprocal.
    gids = jax.lax.broadcasted_iota(jnp.int32, (NUM_GRAPHS, NUM_NODES), 0)
    onehot = (bid_ref[...] == gids).astype(jnp.float32)            # (G, N)
    counts = jnp.sum(onehot, axis=1, keepdims=True)                # (G, 1)
    inv = pl.reciprocal(jnp.maximum(counts, 1.0), approx=True)     # EUP slot
    pool_w = (onehot * inv).astype(jnp.bfloat16)                   # (G, N)
    pooled = jnp.dot(pool_w, h.astype(jnp.bfloat16),
                     preferred_element_type=jnp.float32)           # (G, E) f32

    # fused (last fc + BN + prediction head), lane-dense 128-wide output
    o_ref[...] = jnp.dot(pooled.astype(jnp.bfloat16), wh_ref[...],
                         preferred_element_type=jnp.float32) + bh_ref[...]


# ----------------------------- host-side weight prep (once) ------------------
def fold_params(params):
    """Fold eval-mode BatchNorm into the fc layers and pre-multiply the last fc
    into the prediction head. Done once at load time, NOT per forward call."""
    bn_scale = params["bn_gamma"] / jnp.sqrt(params["bn_var"] + BN_EPS)   # (L, E)
    bn_shift = params["bn_beta"] - params["bn_mean"] * bn_scale           # (L, E)
    w_fold = params["w_fc"] * bn_scale[:, None, :]                        # (L, E, E)
    b_fold = params["b_fc"] * bn_scale + bn_shift                         # (L, E)

    # last layer (no ReLU) commutes with mean-pool -> fold into the head
    w_head = w_fold[-1] @ params["w_pred"]                                # (E, T)
    b_head = b_fold[-1] @ params["w_pred"] + params["b_pred"]             # (T,)

    w_head_p = jnp.zeros((EMB_DIM, PADDED_TASKS), jnp.float32)
    w_head_p = w_head_p.at[:, :NUM_TASKS].set(w_head)
    b_head_p = jnp.zeros((PADDED_TASKS,), jnp.float32).at[:NUM_TASKS].set(b_head)

    return {
        "w_enc":    params["w_enc"],                          # (1, E)     f32
        "b_enc":    params["b_enc"][None, :],                 # (1, E)     f32
        "w_hidden": w_fold[:-1].astype(jnp.bfloat16),         # (L-1, E, E) bf16
        "b_hidden": b_fold[:-1][:, None, :],                  # (L-1, 1, E) f32
        "w_head":   w_head_p.astype(jnp.bfloat16),            # (E, 128)   bf16
        "b_head":   b_head_p[None, :],                        # (1, 128)   f32
    }


# ----------------------------- full forward ----------------------------------
@jax.jit
def mlp_forward(x, batch, folded):
    out_padded = pl.pallas_call(
        fused_mlp_kernel,
        out_shape=jax.ShapeDtypeStruct((NUM_GRAPHS, PADDED_TASKS), jnp.float32),
        # Grid-less call: every operand is a single full-array VMEM block
        # (total footprint ~200 KiB, well within VMEM on v5e/v6e/v7x).
        cost_estimate=pl.CostEstimate(flops=_FLOPS,
                                      transcendentals=NUM_GRAPHS,
                                      bytes_accessed=_BYTES),
        compiler_params=pltpu.CompilerParams(vmem_limit_bytes=32 * 1024 * 1024),
    )(
        x,                                        # (N, 1)
        folded["w_enc"],                          # (1, E)
        folded["b_enc"],                          # (1, E)
        folded["w_hidden"],                       # (L-1, E, E) bf16
        folded["b_hidden"],                       # (L-1, 1, E)
        batch[None, :].astype(jnp.int32),         # (1, N)
        folded["w_head"],                         # (E, 128) bf16
        folded["b_head"],                         # (1, 128)
    )
    return out_padded[:, :NUM_TASKS]


# ----------------------------- pure-JAX reference ----------------------------
def mlp_reference(x, batch, params):
    h = x @ params["w_enc"] + params["b_enc"]
    for l in range(NUM_LAYERS):
        h = h @ params["w_fc"][l] + params["b_fc"][l]
        scale = params["bn_gamma"][l] / jnp.sqrt(params["bn_var"][l] + BN_EPS)
        h = (h - params["bn_mean"][l]) * scale + params["bn_beta"][l]
        if l != NUM_LAYERS - 1:
            h = jnp.maximum(h, 0.0)
    onehot = (batch[None, :] == jnp.arange(NUM_GRAPHS)[:, None]).astype(jnp.float32)
    pooled = (onehot @ h) / jnp.maximum(onehot.sum(1, keepdims=True), 1.0)
    return pooled @ params["w_pred"] + params["b_pred"]


# ----------------------------- deterministic params --------------------------
def make_params(key):
    ks = jax.random.split(key, 10)
    return {
        "w_enc":    0.2 * jax.random.normal(ks[0], (1, EMB_DIM), jnp.float32),
        "b_enc":    0.1 * jax.random.normal(ks[1], (EMB_DIM,), jnp.float32),
        "w_fc":     0.05 * jax.random.normal(ks[2], (NUM_LAYERS, EMB_DIM, EMB_DIM),
                                             jnp.float32),
        "b_fc":     0.1 * jax.random.normal(ks[3], (NUM_LAYERS, EMB_DIM), jnp.float32),
        "bn_gamma": 0.5 + jax.random.uniform(ks[4], (NUM_LAYERS, EMB_DIM), jnp.float32),
        "bn_beta":  0.1 * jax.random.normal(ks[5], (NUM_LAYERS, EMB_DIM), jnp.float32),
        "bn_mean":  0.1 * jax.random.normal(ks[6], (NUM_LAYERS, EMB_DIM), jnp.float32),
        "bn_var":   0.5 + jax.random.uniform(ks[7], (NUM_LAYERS, EMB_DIM), jnp.float32),
        "w_pred":   0.05 * jax.random.normal(ks[8], (EMB_DIM, NUM_TASKS), jnp.float32),
        "b_pred":   0.1 * jax.random.normal(ks[9], (NUM_TASKS,), jnp.float32),
    }


if __name__ == "__main__":
    key = jax.random.PRNGKey(0)
    kx, kp = jax.random.split(key)

    # batched_data.x : node features, shape [N, 1] (RotatedMNIST node encoder)
    x = jax.random.normal(kx, (NUM_NODES, 1), jnp.float32)
    # batched_data.batch : graph id per node, shape [N]
    batch = jnp.repeat(jnp.arange(NUM_GRAPHS, dtype=jnp.int32),
                       NUM_NODES // NUM_GRAPHS)

    params = make_params(kp)
    folded = jax.tree.map(jax.block_until_ready, fold_params(params))  # one-time prep

    out = jax.block_until_ready(mlp_forward(x, batch, folded))

    ref = mlp_reference(x, batch, params)
    assert out.shape == (NUM_GRAPHS, NUM_TASKS)
    # bf16 weights + approx reciprocal -> loosened tolerance vs f32 reference
    assert jnp.allclose(out, ref, atol=5e-2, rtol=5e-2), "mismatch vs reference"

    print("KERNEL_OK")
</pallas_src>

<mosaic_0001>
module attributes {stable_mosaic.version = 11 : i64} {
  func.func @fused_mlp_kernel(%arg0: memref<64x1xf32, #tpu.memory_space<vmem>>, %arg1: memref<1x128xf32, #tpu.memory_space<vmem>>, %arg2: memref<1x128xf32, #tpu.memory_space<vmem>>, %arg3: memref<4x128x128xbf16, #tpu.memory_space<vmem>>, %arg4: memref<4x1x128xf32, #tpu.memory_space<vmem>>, %arg5: memref<1x64xi32, #tpu.memory_space<vmem>>, %arg6: memref<128x128xbf16, #tpu.memory_space<vmem>>, %arg7: memref<1x128xf32, #tpu.memory_space<vmem>>, %arg8: memref<4x128xf32, #tpu.memory_space<vmem>>) attributes {dimension_semantics = [], scalar_prefetch = 0 : i64, scratch_operands = 0 : i64, tpu.core_type = #tpu.core_type<tc>} {
    %c0 = arith.constant 0 : index
    %c0_0 = arith.constant 0 : index
    %0 = vector.load %arg0[%c0, %c0_0] : memref<64x1xf32, #tpu.memory_space<vmem>>, vector<64x1xf32>
    %c0_1 = arith.constant 0 : index
    %c0_2 = arith.constant 0 : index
    %1 = vector.load %arg1[%c0_1, %c0_2] : memref<1x128xf32, #tpu.memory_space<vmem>>, vector<1x128xf32>
    %2 = vector.broadcast %0 : vector<64x1xf32> to vector<64x128xf32>
    %3 = vector.broadcast %1 : vector<1x128xf32> to vector<64x128xf32>
    %4 = arith.mulf %2, %3 : vector<64x128xf32>
    %c0_3 = arith.constant 0 : index
    %c0_4 = arith.constant 0 : index
    %5 = vector.load %arg2[%c0_3, %c0_4] : memref<1x128xf32, #tpu.memory_space<vmem>>, vector<1x128xf32>
    %6 = vector.broadcast %5 : vector<1x128xf32> to vector<64x128xf32>
    %7 = arith.addf %4, %6 : vector<64x128xf32>
    %8 = arith.truncf %7 : vector<64x128xf32> to vector<64x128xbf16>
    %c0_5 = arith.constant 0 : index
    %c0_6 = arith.constant 0 : index
    %c0_7 = arith.constant 0 : index
    %9 = vector.load %arg3[%c0_5, %c0_6, %c0_7] : memref<4x128x128xbf16, #tpu.memory_space<vmem>>, vector<1x128x128xbf16>
    %10 = vector.shape_cast %9 : vector<1x128x128xbf16> to vector<128x128xbf16>
    %cst = arith.constant dense<0.000000e+00> : vector<64x128xf32>
    %11 = tpu.matmul %8, %10, %cst {dimension_numbers = #tpu.dot_dimension_numbers<[1], [0], [0], [1], [0, 0, 1, 1], [], []>} : vector<64x128xbf16>, vector<128x128xbf16>, vector<64x128xf32> -> vector<64x128xf32>
    %c0_8 = arith.constant 0 : index
    %c0_9 = arith.constant 0 : index
    %c0_10 = arith.constant 0 : index
    %12 = vector.load %arg4[%c0_8, %c0_9, %c0_10] : memref<4x1x128xf32, #tpu.memory_space<vmem>>, vector<1x1x128xf32>
    %13 = vector.shape_cast %12 : vector<1x1x128xf32> to vector<1x128xf32>
    %14 = vector.broadcast %13 : vector<1x128xf32> to vector<64x128xf32>
    %15 = arith.addf %11, %14 : vector<64x128xf32>
    %cst_11 = arith.constant 0.000000e+00 : f32
    %16 = vector.broadcast %cst_11 : f32 to vector<64x128xf32>
    %17 = arith.maximumf %15, %16 : vector<64x128xf32>
    %18 = arith.truncf %17 : vector<64x128xf32> to vector<64x128xbf16>
    %c1 = arith.constant 1 : index
    %c0_12 = arith.constant 0 : index
    %c0_13 = arith.constant 0 : index
    %19 = vector.load %arg3[%c1, %c0_12, %c0_13] : memref<4x128x128xbf16, #tpu.memory_space<vmem>>, vector<1x128x128xbf16>
    %20 = vector.shape_cast %19 : vector<1x128x128xbf16> to vector<128x128xbf16>
    %cst_14 = arith.constant dense<0.000000e+00> : vector<64x128xf32>
    %21 = tpu.matmul %18, %20, %cst_14 {dimension_numbers = #tpu.dot_dimension_numbers<[1], [0], [0], [1], [0, 0, 1, 1], [], []>} : vector<64x128xbf16>, vector<128x128xbf16>, vector<64x128xf32> -> vector<64x128xf32>
    %c1_15 = arith.constant 1 : index
    %c0_16 = arith.constant 0 : index
    %c0_17 = arith.constant 0 : index
    %22 = vector.load %arg4[%c1_15, %c0_16, %c0_17] : memref<4x1x128xf32, #tpu.memory_space<vmem>>, vector<1x1x128xf32>
    %23 = vector.shape_cast %22 : vector<1x1x128xf32> to vector<1x128xf32>
    %24 = vector.broadcast %23 : vector<1x128xf32> to vector<64x128xf32>
    %25 = arith.addf %21, %24 : vector<64x128xf32>
    %cst_18 = arith.constant 0.000000e+00 : f32
    %26 = vector.broadcast %cst_18 : f32 to vector<64x128xf32>
    %27 = arith.maximumf %25, %26 : vector<64x128xf32>
    %28 = arith.truncf %27 : vector<64x128xf32> to vector<64x128xbf16>
    %c2 = arith.constant 2 : index
    %c0_19 = arith.constant 0 : index
    %c0_20 = arith.constant 0 : index
    %29 = vector.load %arg3[%c2, %c0_19, %c0_20] : memref<4x128x128xbf16, #tpu.memory_space<vmem>>, vector<1x128x128xbf16>
    %30 = vector.shape_cast %29 : vector<1x128x128xbf16> to vector<128x128xbf16>
    %cst_21 = arith.constant dense<0.000000e+00> : vector<64x128xf32>
    %31 = tpu.matmul %28, %30, %cst_21 {dimension_numbers = #tpu.dot_dimension_numbers<[1], [0], [0], [1], [0, 0, 1, 1], [], []>} : vector<64x128xbf16>, vector<128x128xbf16>, vector<64x128xf32> -> vector<64x128xf32>
    %c2_22 = arith.constant 2 : index
    %c0_23 = arith.constant 0 : index
    %c0_24 = arith.constant 0 : index
    %32 = vector.load %arg4[%c2_22, %c0_23, %c0_24] : memref<4x1x128xf32, #tpu.memory_space<vmem>>, vector<1x1x128xf32>
    %33 = vector.shape_cast %32 : vector<1x1x128xf32> to vector<1x128xf32>
    %34 = vector.broadcast %33 : vector<1x128xf32> to vector<64x128xf32>
    %35 = arith.addf %31, %34 : vector<64x128xf32>
    %cst_25 = arith.constant 0.000000e+00 : f32
    %36 = vector.broadcast %cst_25 : f32 to vector<64x128xf32>
    %37 = arith.maximumf %35, %36 : vector<64x128xf32>
    %38 = arith.truncf %37 : vector<64x128xf32> to vector<64x128xbf16>
    %c3 = arith.constant 3 : index
    %c0_26 = arith.constant 0 : index
    %c0_27 = arith.constant 0 : index
    %39 = vector.load %arg3[%c3, %c0_26, %c0_27] : memref<4x128x128xbf16, #tpu.memory_space<vmem>>, vector<1x128x128xbf16>
    %40 = vector.shape_cast %39 : vector<1x128x128xbf16> to vector<128x128xbf16>
    %cst_28 = arith.constant dense<0.000000e+00> : vector<64x128xf32>
    %41 = tpu.matmul %38, %40, %cst_28 {dimension_numbers = #tpu.dot_dimension_numbers<[1], [0], [0], [1], [0, 0, 1, 1], [], []>} : vector<64x128xbf16>, vector<128x128xbf16>, vector<64x128xf32> -> vector<64x128xf32>
    %c3_29 = arith.constant 3 : index
    %c0_30 = arith.constant 0 : index
    %c0_31 = arith.constant 0 : index
    %42 = vector.load %arg4[%c3_29, %c0_30, %c0_31] : memref<4x1x128xf32, #tpu.memory_space<vmem>>, vector<1x1x128xf32>
    %43 = vector.shape_cast %42 : vector<1x1x128xf32> to vector<1x128xf32>
    %44 = vector.broadcast %43 : vector<1x128xf32> to vector<64x128xf32>
    %45 = arith.addf %41, %44 : vector<64x128xf32>
    %cst_32 = arith.constant 0.000000e+00 : f32
    %46 = vector.broadcast %cst_32 : f32 to vector<64x128xf32>
    %47 = arith.maximumf %45, %46 : vector<64x128xf32>
    %48 = tpu.iota {dimensions = array<i32: 0>} : vector<4x64xi32>
    %c0_33 = arith.constant 0 : index
    %c0_34 = arith.constant 0 : index
    %49 = vector.load %arg5[%c0_33, %c0_34] : memref<1x64xi32, #tpu.memory_space<vmem>>, vector<1x64xi32>
    %50 = vector.broadcast %49 : vector<1x64xi32> to vector<4x64xi32>
    %51 = arith.cmpi eq, %50, %48 : vector<4x64xi32>
    %52 = arith.extui %51 : vector<4x64xi1> to vector<4x64xi32>
    %53 = arith.sitofp %52 : vector<4x64xi32> to vector<4x64xf32>
    %cst_35 = arith.constant dense<0.000000e+00> : vector<4xf32>
    %54 = vector.multi_reduction <add>, %53, %cst_35 [1] : vector<4x64xf32> to vector<4xf32>
    %55 = vector.shape_cast %54 : vector<4xf32> to vector<4x1xf32>
    %cst_36 = arith.constant 1.000000e+00 : f32
    %56 = vector.broadcast %cst_36 : f32 to vector<4x1xf32>
    %57 = arith.maximumf %55, %56 : vector<4x1xf32>
    %58 = tpu.reciprocal %57 {approx = true} : vector<4x1xf32> -> vector<4x1xf32>
    %59 = vector.broadcast %58 : vector<4x1xf32> to vector<4x64xf32>
    %60 = arith.mulf %53, %59 : vector<4x64xf32>
    %61 = arith.truncf %60 : vector<4x64xf32> to vector<4x64xbf16>
    %62 = arith.truncf %47 : vector<64x128xf32> to vector<64x128xbf16>
    %cst_37 = arith.constant dense<0.000000e+00> : vector<4x128xf32>
    %63 = tpu.matmul %61, %62, %cst_37 {dimension_numbers = #tpu.dot_dimension_numbers<[1], [0], [0], [1], [0, 0, 1, 1], [], []>} : vector<4x64xbf16>, vector<64x128xbf16>, vector<4x128xf32> -> vector<4x128xf32>
    %64 = arith.truncf %63 : vector<4x128xf32> to vector<4x128xbf16>
    %c0_38 = arith.constant 0 : index
    %c0_39 = arith.constant 0 : index
    %65 = vector.load %arg6[%c0_38, %c0_39] : memref<128x128xbf16, #tpu.memory_space<vmem>>, vector<128x128xbf16>
    %cst_40 = arith.constant dense<0.000000e+00> : vector<4x128xf32>
    %66 = tpu.matmul %64, %65, %cst_40 {dimension_numbers = #tpu.dot_dimension_numbers<[1], [0], [0], [1], [0, 0, 1, 1], [], []>} : vector<4x128xbf16>, vector<128x128xbf16>, vector<4x128xf32> -> vector<4x128xf32>
    %c0_41 = arith.constant 0 : index
    %c0_42 = arith.constant 0 : index
    %67 = vector.load %arg7[%c0_41, %c0_42] : memref<1x128xf32, #tpu.memory_space<vmem>>, vector<1x128xf32>
    %68 = vector.broadcast %67 : vector<1x128xf32> to vector<4x128xf32>
    %69 = arith.addf %66, %68 : vector<4x128xf32>
    %c0_43 = arith.constant 0 : index
    %c0_44 = arith.constant 0 : index
    %70 = vector.load %arg8[%c0_43, %c0_44] : memref<4x128xf32, #tpu.memory_space<vmem>>, vector<4x128xf32>
    tpu.vector_store %arg8[%c0_43, %c0_44], %69 {strides = array<i32>} : memref<4x128xf32, #tpu.memory_space<vmem>>, vector<4x128xf32>,
    return
  }
}

</mosaic_0001>

<bundles_post_ra>
// kernel: mlp_forward.1
= control target key start
LH: loop header
LB: loop body
LE: loop exit
PB: predicated region body
PF: predicated region fallthrough
CT: control target
= control target key end

     0   :  { %13 = vsyncpa [#allocation3], 0  ;;  %s1424_s0 = inlined_call_operand.vmem [shape: f32[64,1], index: 0, kind: input, shape index: {}]   ;;  %s1425_s1 = inlined_call_operand.vmem [shape: f32[1,128], index: 1, kind: input, shape index: {}]   ;;  %s1426_s2 = inlined_call_operand.vmem [shape: f32[1,128], index: 2, kind: input, shape index: {}]   ;;  %s1427_s3 = inlined_call_operand.hbm [shape: bf16[4,128,128], index: 3, kind: input, shape index: {}]   ;;  %s1428_s4 = inlined_call_operand.vmem [shape: f32[4,1,128], index: 4, kind: input, shape index: {}]   ;;  %s1429_s5 = inlined_call_operand.vmem [shape: s32[1,64], index: 5, kind: input, shape index: {}]   ;;  %s1430_s6 = inlined_call_operand.vmem [shape: bf16[128,128], index: 6, kind: input, shape index: {}]   ;;  %s1431_s7 = inlined_call_operand.vmem [shape: f32[1,128], index: 7, kind: input, shape index: {}]   ;;  %s1432_s8 = inlined_call_operand.hbm [shape: f32[4,128], index: 8, kind: output, shape index: {}]  }
   0x1   :  { %14 = vsyncpa [#allocation4], 0  ;;  %s1257_s27 = smov [#allocation2]   ;;  %s1209_s9 = scalar_lea.hbm %s1427_s3, 4096 }
   0x2   :  { %s26_s28 = sshll.u32 %s1257_s27, 4  ;;  %p1210_p0 = scmp.ne.s32.totalorder %s1427_s3, %s1209_s9  ;;  %s27_s28 = int_to_ptr.vmem [resolvable:$true] %s26_s28 }
   0x3   :  { %p1213_p1 = scmp.lt.u32.totalorder %s1209_s9, %s1427_s3 }
   0x5   :  { %p1215_p2 = pnand %p1213_p1, %p1210_p0 }
   0x7   :  { %1218 = shalt.err (!%p1215_p2)
}
   0x8   :  { %s1219_s14 = scalar_lea.vmem %s27_s28, 4096  ;;  %p1224_p4 = scmp.lt.s32.totalorder %s27_s28, %s27_s28 }
   0x9   :  { %p1220_p3 = scmp.ne.s32.totalorder %s27_s28, %s1219_s14  ;;  %p1225_p5 = scmp.lt.s32.totalorder %s1219_s14, %s1219_s14 }
   0xb   :  { %p1226_p6 = por %p1225_p5, %p1224_p4 }
   0xd   :  { %p1227_p7 = pnand %p1226_p6, %p1220_p3 }
   0xf   :  { %1230 = shalt.err (!%p1227_p7)
}
  0x10   :  { %s1258_s15 = smov 64   ;;  %s1259_s16 = smov 4  }
  0x11   :  { %32 = dma.hbm_to_vmem [thread:$0]  %s1427_s3, 4096, %s27_s28, [#allocation3], %s1258_s15, %s1258_s15, %s1259_s16  }
  0x12   :  { %1253 = dma.done.wait [#allocation3], 4096  }
  0x13   :  { %1254 = vsyncadd [#allocation3], 4294963200  ;;  %v1260_v0 = vmov 0   ;;  %v47_v1 = vld [vmem:[%s1424_s0 + $0x10] sm:$0xff]  ;;  %v45_v2 = vld [vmem:[%s1424_s0] sm:$0xff]  ;;  %vm731_vm0 = vcmask 519168  }
  0x14   :  { %1166 = vset.pattern.permute.xlu1 %v1260_v0  ;;  %1165 = vset.pattern.permute.xlu0 %v1260_v0  ;;  %v48_v3 = vld [vmem:[%s1424_s0 + $0x18] sm:$0xff]  ;;  %v46_v4 = vld [vmem:[%s1424_s0 + $0x8] sm:$0xff]  ;;  %v1167_v5 = vld [vmem:[#allocation2] sm:$0xff]   ;;  %vm1262_vm2 = vmmov 0   ;;  %vm743_vm3 = vcmask 523264  }
  0x15   :  { %66 = vperm.xlu1 %1166, %v47_v1   ;;  %56 = vperm.xlu0 %1165, %v45_v2   ;;  %v1168_v6 = vld [vmem:[#allocation2 + $0x8] sm:$0xff]   ;;  %v49_v8 = vld [vmem:[%s1424_s0 + $0x20] sm:$0xff]  ;;  %v1169_v9 = vld [vmem:[#allocation2 + $0x10] sm:$0xff]  }
  0x16   :  { %v50_v7 = vld [vmem:[%s1424_s0 + $0x28] sm:$0xff]  ;;  %1030 = vmatprep.subr.bf16.mxu0 %v1167_v5  ;;  %v52_v10 = vld [vmem:[%s1424_s0 + $0x38] sm:$0xff]  ;;  %v51_v11 = vld [vmem:[%s1424_s0 + $0x30] sm:$0xff] }
  0x17   :  { %1031 = vmatpush3.bf16.msra.mxu0 %v1167_v5  ;;  %v1170_v12 = vld [vmem:[#allocation2 + $0x18] sm:$0xff]   ;;  %v1171_v13 = vld [vmem:[#allocation2 + $0x20] sm:$0xff]   ;;  %v1172_v14 = vld [vmem:[#allocation2 + $0x28] sm:$0xff]  }
  0x18   :  { %1032 = vmatprep.subr.bf16.mxu0 %v1168_v6  ;;  %v1175_v15 = vld [vmem:[#allocation2 + $0x40] sm:$0xff]   ;;  %v1176_v16 = vld [vmem:[#allocation2 + $0x48] sm:$0xff]   ;;  %v1173_v17 = vld [vmem:[#allocation2 + $0x30] sm:$0xff]  }
  0x19   :  { %71 = vperm.xlu1 %1166, %v48_v3   ;;  %61 = vperm.xlu0 %1165, %v46_v4   ;;  %v1177_v18 = vld [vmem:[#allocation2 + $0x50] sm:$0xff]   ;;  %v1174_v19 = vld [vmem:[#allocation2 + $0x38] sm:$0xff]   ;;  %v1179_v21 = vld [vmem:[#allocation2 + $0x60] sm:$0xff]  }
  0x1a   :  { %1054 = vmatprep.subr.bf16.mxu1 %v1175_v15  ;;  %v1178_v20 = vld [vmem:[#allocation2 + $0x58] sm:$0xff]   ;;  %v1180_v22 = vld [vmem:[#allocation2 + $0x68] sm:$0xff]   ;;  %v915_v23 = vld [vmem:[%s1425_s1] ss:$0 sm:$0xff]  ;;  %s1263_s1 = smov [#allocation5]  }
  0x1b   :  { %1033 = vmatpush3.bf16.msra.mxu0 %v1168_v6  ;;  %1055 = vmatpush3.bf16.msra.mxu1 %v1175_v15  ;;  %v916_v28 = vld [vmem:[%s1426_s2] ss:$0 sm:$0xff]  ;;  %v1181_v53 = vld [vmem:[#allocation2 + $0x70] sm:$0xff]   ;;  %v1182_v54 = vld [vmem:[#allocation2 + $0x78] sm:$0xff]   ;;  %s906_s2 = sshll.u32 %s1263_s1, 4  ;;  %s907_s2 = int_to_ptr.vmem [resolvable:$true] %s906_s2 }
  0x1c   :  { %1034 = vmatprep.subr.bf16.mxu0 %v1169_v9  ;;  %1056 = vmatprep.subr.bf16.mxu1 %v1176_v16  ;;  %v1183_v55 = vld [vmem:[#allocation2 + $0x80] sm:$0xff]   ;;  %v1184_v56 = vld [vmem:[#allocation2 + $0x88] sm:$0xff]   ;;  %v1185_v57 = vld [vmem:[#allocation2 + $0x90] sm:$0xff]   ;;  %p1236_p9 = scmp.lt.s32.totalorder %s907_s2, %s907_s2 }
  0x1d   :  { %81 = vperm.xlu1 %1166, %v50_v7   ;;  %76 = vperm.xlu0 %1165, %v49_v8   ;;  %v1186_v58 = vld [vmem:[#allocation2 + $0x98] sm:$0xff]   ;;  %v1187_v59 = vld [vmem:[#allocation2 + $0xa0] sm:$0xff]   ;;  %v1188_v60 = vld [vmem:[#allocation2 + $0xa8] sm:$0xff]  }
  0x1e   :  { %v917_v61 = vld [vmem:[%s1428_s4] ss:$0 sm:$0xff] }
  0x1f   :  { %1035 = vmatpush3.bf16.msra.mxu0 %v1169_v9  ;;  %1057 = vmatpush3.bf16.msra.mxu1 %v1176_v16 }
  0x20   :  { %1036 = vmatprep.subr.bf16.mxu0 %v1170_v12  ;;  %1058 = vmatprep.subr.bf16.mxu1 %v1177_v18 }
  0x21   :  { %91 = vperm.xlu1 %1166, %v52_v10   ;;  %86 = vperm.xlu0 %1165, %v51_v11  }
  0x23   :  { %1037 = vmatpush3.bf16.msra.mxu0 %v1170_v12  ;;  %1059 = vmatpush3.bf16.msra.mxu1 %v1177_v18 }
  0x24   :  { %1038 = vmatprep.subr.bf16.mxu0 %v1171_v13  ;;  %1060 = vmatprep.subr.bf16.mxu1 %v1178_v20 }
  0x27   :  { %1039 = vmatpush3.bf16.msra.mxu0 %v1171_v13  ;;  %1061 = vmatpush3.bf16.msra.mxu1 %v1178_v20 }
  0x28   :  { %1040 = vmatprep.subr.bf16.mxu0 %v1172_v14  ;;  %1062 = vmatprep.subr.bf16.mxu1 %v1179_v21 }
  0x2b   :  { %1041 = vmatpush3.bf16.msra.mxu0 %v1172_v14  ;;  %1063 = vmatpush3.bf16.msra.mxu1 %v1179_v21 }
  0x2c   :  { %1042 = vmatprep.subr.bf16.mxu0 %v1173_v17  ;;  %1064 = vmatprep.subr.bf16.mxu1 %v1180_v22 }
  0x2f   :  { %1043 = vmatpush3.bf16.msra.mxu0 %v1173_v17  ;;  %1065 = vmatpush3.bf16.msra.mxu1 %v1180_v22 }
  0x30   :  { %1044 = vmatprep.subr.bf16.mxu0 %v1174_v19  ;;  %1066 = vmatprep.subr.bf16.mxu1 %v1181_v53 }
  0x33   :  { %1045 = vmatpush3.bf16.msra.mxu0 %v1174_v19  ;;  %1067 = vmatpush3.bf16.msra.mxu1 %v1181_v53 }
  0x34   :  { %1068 = vmatprep.subr.bf16.mxu1 %v1182_v54  ;;  %1078 = vmatprep.subr.bf16.mxu0 %v1183_v55 }
  0x37   :  { %1069 = vmatpush3.bf16.msra.mxu1 %v1182_v54 }
  0x94   :  { %v67_v24 = vpop.permute.xlu1 %66  ;;  %v57_v25 = vpop.permute.xlu0 %56 }
  0x95   :  { %v102_v26 = vmul.f32 %v915_v23, %v67_v24  ;;  %v100_v27 = vmul.f32 %v915_v23, %v57_v25 }
  0x97   :  { %v117_v33 = vadd.f32 %v916_v28, %v102_v26  ;;  %v115_v35 = vadd.f32 %v916_v28, %v100_v27  ;;  %v1189_v26 = vld [vmem:[#allocation2 + $0xb0] sm:$0xff]   ;;  %v1190_v27 = vld [vmem:[#allocation2 + $0xb8] sm:$0xff]  }
  0x98   :  { %v72_v29 = vpop.permute.xlu1 %71  ;;  %v62_v30 = vpop.permute.xlu0 %61 }
  0x99   :  { %v103_v31 = vmul.f32 %v915_v23, %v72_v29  ;;  %v101_v32 = vmul.f32 %v915_v23, %v62_v30  ;;  %v1192_v29 = vld [vmem:[#allocation2 + $0xc8] sm:$0xff]   ;;  %v1193_v30 = vld [vmem:[#allocation2 + $0xd0] sm:$0xff]  }
  0x9b   :  { %v118_v34 = vadd.f32 %v916_v28, %v103_v31  ;;  %v116_v36 = vadd.f32 %v916_v28, %v101_v32  ;;  %v1194_v31 = vld [vmem:[#allocation2 + $0xd8] sm:$0xff]   ;;  %v1195_v32 = vld [vmem:[#allocation2 + $0xe0] sm:$0xff]  }
  0x9c   :  { %v82_v37 = vpop.permute.xlu1 %81  ;;  %v77_v38 = vpop.permute.xlu0 %76 }
  0x9d   :  { %v105_v39 = vmul.f32 %v915_v23, %v82_v37  ;;  %v104_v40 = vmul.f32 %v915_v23, %v77_v38  ;;  %v123_v41 = vpack.c.bf16 %v116_v36, %v115_v35  ;;  %v124_v42 = vpack.c.bf16 %v118_v34, %v117_v33  ;;  %v1196_v33 = vld [vmem:[#allocation2 + $0xe8] sm:$0xff]   ;;  %v927_v34 = vld [vmem:[%s1428_s4 + $0x1] ss:$0 sm:$0xff] }
  0x9f   :  { %v120_v43 = vadd.f32 %v916_v28, %v105_v39  ;;  %v119_v44 = vadd.f32 %v916_v28, %v104_v40  ;;  %1046 = vmatprep.mubr.bf16.mxu0 %v123_v41 }
  0xa0   :  { %v92_v45 = vpop.permute.xlu1 %91  ;;  %1047 = vmatmul.mubr.bf16.vlgmr.msra.gmra.mrb[0].mxu0 %v124_v42  ;;  %v87_v46 = vpop.permute.xlu0 %86 }
  0xa1   :  { %v107_v47 = vmul.f32 %v915_v23, %v92_v45  ;;  %v106_v48 = vmul.f32 %v915_v23, %v87_v46  ;;  %v125_v49 = vpack.c.bf16 %v120_v43, %v119_v44  ;;  %1079 = vmatpush3.bf16.msra.mxu0 %v1183_v55 }
  0xa2   :  { %1080 = vmatprep.subr.bf16.mxu0 %v1184_v56 }
  0xa3   :  { %v122_v50 = vadd.f32 %v916_v28, %v107_v47  ;;  %v121_v51 = vadd.f32 %v916_v28, %v106_v48  ;;  %1050 = vmatprep.mubr.bf16.mxu0 %v125_v49  ;;  %v1191_v28 = vld [vmem:[#allocation2 + $0xc0] sm:$0xff]  }
  0xa4   :  { %1102 = vmatprep.subr.bf16.mxu1 %v1191_v28 }
  0xa5   :  { %v126_v52 = vpack.c.bf16 %v122_v50, %v121_v51  ;;  %1081 = vmatpush3.bf16.msra.mxu0 %v1184_v56 }
  0xa6   :  { %1082 = vmatprep.subr.bf16.mxu0 %v1185_v57 }
  0xa8   :  { %1051 = vmatmul.mubr.bf16.gmra.mrb[4].mxu0 %v126_v52 }
  0xa9   :  { %1083 = vmatpush3.bf16.msra.mxu0 %v1185_v57 }
  0xaa   :  { %1084 = vmatprep.subr.bf16.mxu0 %v1186_v58 }
  0xad   :  { %1085 = vmatpush3.bf16.msra.mxu0 %v1186_v58 }
  0xae   :  { %1086 = vmatprep.subr.bf16.mxu0 %v1187_v59 }
  0xb1   :  { %1087 = vmatpush3.bf16.msra.mxu0 %v1187_v59 }
  0xb2   :  { %1088 = vmatprep.subr.bf16.mxu0 %v1188_v60 }
  0xb5   :  { %1089 = vmatpush3.bf16.msra.mxu0 %v1188_v60 }
  0xb6   :  { %1090 = vmatprep.subr.bf16.mxu0 %v1189_v26 }
  0xb9   :  { %1091 = vmatpush3.bf16.msra.mxu0 %v1189_v26 }
  0xba   :  { %1092 = vmatprep.subr.bf16.mxu0 %v1190_v27 }
  0xbd   :  { %1093 = vmatpush3.bf16.msra.mxu0 %v1190_v27 }
 0x173   :  { %v1048_v62 = vpop.f32.mrb[0].mxu0 }
 0x174   :  { %v241_v63 = vadd.f32 %v1048_v62, %v917_v61  ;;  %v232_v0 = vpop.f32.mrb[1].mxu0 }
 0x175   :  { %v233_v1 = vadd.f32 %v917_v61, %v232_v0  ;;  %v1049_v2 = vpop.f32.mrb[2].mxu0  ;;  %v1198_v0 = vld [vmem:[#allocation2 + $0xf8] sm:$0xff]  }
 0x176   :  { %v244_v3 = vadd.f32 %v1049_v2, %v917_v61  ;;  %v235_v4 = vpop.f32.mrb[3].mxu0  ;;  %v265_v6 = vmax.f32 %v241_v63, 0.0  ;;  %v1197_v63 = vld [vmem:[#allocation2 + $0xf0] sm:$0xff]   ;;  %v956_v2 = vld [vmem:[%s1429_s5] ss:$0 sm:$0xff] }
 0x177   :  { %v236_v5 = vadd.f32 %v917_v61, %v235_v4  ;;  %v263_v8 = vmax.f32 %v233_v1, 0.0  ;;  %v721_v1 = vlaneseq }
 0x178   :  { %v266_v7 = vmax.f32 %v244_v3, 0.0  ;;  %v1261_v3 = vmov 0.0  }
 0x179   :  { %v264_v9 = vmax.f32 %v236_v5, 0.0  ;;  %1126 = vmatprep.subr.bf16.mxu0 %v1261_v3  ;;  %v722_v4 = vshrl.u32 %v721_v1, 7 }
 0x17a   :  { %v272_v10 = vpack.c.bf16 %v266_v7, %v265_v6  ;;  %v937_v7 = vld [vmem:[%s1428_s4 + $0x2] ss:$0 sm:$0xff] }
 0x17b   :  { %v1052_v11 = vpop.f32.mrb[4].mxu0  ;;  %v271_v12 = vpack.c.bf16 %v264_v9, %v263_v8  ;;  %vm728_vm1 = vcmp.eq.s32.totalorder %v956_v2, %v722_v4 }
 0x17c   :  { %v257_v13 = vadd.f32 %v1052_v11, %v917_v61  ;;  %v248_v14 = vpop.f32.mrb[5].mxu0  ;;  %v1363_v5 = vsel %vm728_vm1, 1.0, %v1261_v3 }
 0x17d   :  { %v249_v15 = vadd.f32 %v917_v61, %v248_v14  ;;  %v1053_v16 = vpop.f32.mrb[6].mxu0  ;;  %1070 = vmatprep.mubr.bf16.mxu1 %v271_v12  ;;  %v732_v6 = vsel %vm731_vm0, %v1363_v5, 0.0 }
 0x17e   :  { %v260_v17 = vadd.f32 %v1053_v16, %v917_v61  ;;  %v251_v18 = vpop.f32.mrb[7].mxu0  ;;  %1071 = vmatmul.mubr.bf16.vlgmr.msra.gmra.mrb[0].mxu1 %v272_v10  ;;  %v269_v20 = vmax.f32 %v257_v13, 0.0  ;;  %733 = vadd.xlane.f32.xlu0 %v732_v6 }
 0x17f   :  { %v252_v19 = vadd.f32 %v917_v61, %v251_v18  ;;  %v267_v22 = vmax.f32 %v249_v15, 0.0  ;;  %1103 = vmatpush3.bf16.msra.mxu1 %v1191_v28 }
 0x180   :  { %v270_v21 = vmax.f32 %v260_v17, 0.0  ;;  %1104 = vmatprep.subr.bf16.mxu1 %v1192_v29 }
 0x181   :  { %v268_v23 = vmax.f32 %v252_v19, 0.0 }
 0x182   :  { %v274_v24 = vpack.c.bf16 %v270_v21, %v269_v20 }
 0x183   :  { %v273_v25 = vpack.c.bf16 %v268_v23, %v267_v22  ;;  %1105 = vmatpush3.bf16.msra.mxu1 %v1192_v29 }
 0x184   :  { %1106 = vmatprep.subr.bf16.mxu1 %v1193_v30 }
 0x185   :  { %1074 = vmatprep.mubr.bf16.mxu1 %v273_v25 }
 0x186   :  { %1075 = vmatmul.mubr.bf16.gmra.mrb[4].mxu1 %v274_v24 }
 0x187   :  { %1107 = vmatpush3.bf16.msra.mxu1 %v1193_v30 }
 0x188   :  { %1108 = vmatprep.subr.bf16.mxu1 %v1194_v31 }
 0x18b   :  { %1109 = vmatpush3.bf16.msra.mxu1 %v1194_v31 }
 0x18c   :  { %1110 = vmatprep.subr.bf16.mxu1 %v1195_v32 }
 0x18f   :  { %1111 = vmatpush3.bf16.msra.mxu1 %v1195_v32 }
 0x190   :  { %1112 = vmatprep.subr.bf16.mxu1 %v1196_v33 }
 0x193   :  { %1113 = vmatpush3.bf16.msra.mxu1 %v1196_v33 }
 0x194   :  { %1114 = vmatprep.subr.bf16.mxu1 %v1197_v63 }
 0x197   :  { %1115 = vmatpush3.bf16.msra.mxu1 %v1197_v63 }
 0x198   :  { %1116 = vmatprep.subr.bf16.mxu1 %v1198_v0 }
 0x19b   :  { %1117 = vmatpush3.bf16.msra.mxu1 %v1198_v0 }
 0x19c   :  { %1138 = vmatprep.subr.bf16.mxu1 %v1261_v3 }
 0x251   :  { %v1072_v35 = vpop.f32.mrb[0].mxu1 }
 0x252   :  { %v391_v36 = vadd.f32 %v1072_v35, %v927_v34  ;;  %v382_v37 = vpop.f32.mrb[1].mxu1 }
 0x253   :  { %v383_v38 = vadd.f32 %v927_v34, %v382_v37  ;;  %v1073_v39 = vpop.f32.mrb[2].mxu1  ;;  %v1200_v37 = vld [vmem:[%s1430_s6 + $0x8] sm:$0xff]  }
 0x254   :  { %v394_v40 = vadd.f32 %v1073_v39, %v927_v34  ;;  %v385_v41 = vpop.f32.mrb[3].mxu1  ;;  %v415_v43 = vmax.f32 %v391_v36, 0.0  ;;  %v1199_v36 = vld [vmem:[%s1430_s6] sm:$0xff]   ;;  %v1202_v39 = vld [vmem:[%s1430_s6 + $0x18] sm:$0xff]  }
 0x255   :  { %v386_v42 = vadd.f32 %v927_v34, %v385_v41  ;;  %v413_v45 = vmax.f32 %v383_v38, 0.0  ;;  %v1201_v38 = vld [vmem:[%s1430_s6 + $0x10] sm:$0xff]   ;;  %v1204_v41 = vld [vmem:[%s1430_s6 + $0x28] sm:$0xff]  }
 0x256   :  { %v416_v44 = vmax.f32 %v394_v40, 0.0  ;;  %v1203_v40 = vld [vmem:[%s1430_s6 + $0x20] sm:$0xff]  }
 0x257   :  { %v414_v46 = vmax.f32 %v386_v42, 0.0  ;;  %v1205_v42 = vld [vmem:[%s1430_s6 + $0x30] sm:$0xff]  }
 0x258   :  { %v422_v47 = vpack.c.bf16 %v416_v44, %v415_v43  ;;  %v734_v43 = vpop.xlane.xlu0 %733  ;;  %v947_v44 = vld [vmem:[%s1428_s4 + $0x3] ss:$0 sm:$0xff] }
 0x259   :  { %v421_v48 = vpack.c.bf16 %v414_v46, %v413_v45  ;;  %v1076_v49 = vpop.f32.mrb[4].mxu1  ;;  %v735_v46 = vmax.f32 %v734_v43, 1.0 }
 0x25a   :  { %v407_v50 = vadd.f32 %v1076_v49, %v927_v34  ;;  %v398_v51 = vpop.f32.mrb[5].mxu1 }
 0x25b   :  { %v399_v52 = vadd.f32 %v927_v34, %v398_v51  ;;  %v1077_v53 = vpop.f32.mrb[6].mxu1  ;;  %1094 = vmatprep.mubr.bf16.mxu0 %v421_v48  ;;  %1207 = vrcp.f32 %v735_v46 }
 0x25c   :  { %v410_v54 = vadd.f32 %v1077_v53, %v927_v34  ;;  %v401_v55 = vpop.f32.mrb[7].mxu1  ;;  %1095 = vmatmul.mubr.bf16.vlgmr.msra.gmra.mrb[8].mxu0 %v422_v47  ;;  %v419_v57 = vmax.f32 %v407_v50, 0.0 }
 0x25d   :  { %v402_v56 = vadd.f32 %v927_v34, %v401_v55  ;;  %v417_v59 = vmax.f32 %v399_v52, 0.0 }
 0x25e   :  { %v420_v58 = vmax.f32 %v410_v54, 0.0 }
 0x25f   :  { %v418_v60 = vmax.f32 %v402_v56, 0.0 }
 0x260   :  { %v424_v61 = vpack.c.bf16 %v420_v58, %v419_v57 }
 0x261   :  { %v423_v62 = vpack.c.bf16 %v418_v60, %v417_v59 }
 0x263   :  { %1098 = vmatprep.mubr.bf16.mxu0 %v423_v62 }
 0x264   :  { %1099 = vmatmul.mubr.bf16.gmra.mrb[12].mxu0 %v424_v61 }
 0x265   :  { %1134 = vmatprep.mubr.msk.bf16.mxu0 %vm1262_vm2, %v1261_v3 }
 0x32f   :  { %v1096_v8 = vpop.f32.mrb[8].mxu0 }
 0x330   :  { %v541_v9 = vadd.f32 %v1096_v8, %v937_v7  ;;  %v532_v10 = vpop.f32.mrb[9].mxu0  ;;  %v1208_v8 = vpop.eup %1207 }
 0x331   :  { %v533_v11 = vadd.f32 %v937_v7, %v532_v10  ;;  %v1097_v12 = vpop.f32.mrb[10].mxu0 }
 0x332   :  { %v544_v13 = vadd.f32 %v1097_v12, %v937_v7  ;;  %v535_v14 = vpop.f32.mrb[11].mxu0  ;;  %v565_v16 = vmax.f32 %v541_v9, 0.0 }
 0x333   :  { %v536_v15 = vadd.f32 %v937_v7, %v535_v14  ;;  %v563_v18 = vmax.f32 %v533_v11, 0.0 }
 0x334   :  { %v566_v17 = vmax.f32 %v544_v13, 0.0  ;;  %v737_v13 = vmul.f32 %v1208_v8, %v1363_v5  ;;  %v959_v5 = vld [vmem:[%s1431_s7] ss:$0 sm:$0xff] }
 0x335   :  { %v564_v19 = vmax.f32 %v536_v15, 0.0  ;;  %v1206_v15 = vld [vmem:[%s1430_s6 + $0x38] sm:$0xff]   ;;  %s1231_s6 = scalar_lea.vmem %s907_s2, 64 }
 0x336   :  { %v572_v20 = vpack.c.bf16 %v566_v17, %v565_v16  ;;  %v738_v14 = vpack.c.bf16 %v737_v13, %v737_v13  ;;  %p1232_p8 = scmp.ne.s32.totalorder %s907_s2, %s1231_s6  ;;  %p1237_p10 = scmp.lt.s32.totalorder %s1231_s6, %s1231_s6 }
 0x337   :  { %v571_v21 = vpack.c.bf16 %v564_v19, %v563_v18  ;;  %v1100_v22 = vpop.f32.mrb[12].mxu0 }
 0x338   :  { %v557_v23 = vadd.f32 %v1100_v22, %v937_v7  ;;  %v548_v24 = vpop.f32.mrb[13].mxu0  ;;  %p1238_p11 = por %p1237_p10, %p1236_p9 }
 0x339   :  { %v549_v25 = vadd.f32 %v937_v7, %v548_v24  ;;  %v1101_v26 = vpop.f32.mrb[14].mxu0  ;;  %1118 = vmatprep.mubr.bf16.mxu1 %v571_v21 }
 0x33a   :  { %v560_v27 = vadd.f32 %v1101_v26, %v937_v7  ;;  %v551_v28 = vpop.f32.mrb[15].mxu0  ;;  %1119 = vmatmul.mubr.bf16.vlgmr.msra.gmra.mrb[8].mxu1 %v572_v20  ;;  %v569_v30 = vmax.f32 %v557_v23, 0.0  ;;  %p1239_p12 = pnand %p1238_p11, %p1232_p8 }
 0x33b   :  { %v552_v29 = vadd.f32 %v937_v7, %v551_v28  ;;  %v567_v32 = vmax.f32 %v549_v25, 0.0  ;;  %1139 = vmatpush3.bf16.msra.mxu1 %v1199_v36 }
 0x33c   :  { %v570_v31 = vmax.f32 %v560_v27, 0.0  ;;  %1140 = vmatprep.subr.bf16.mxu1 %v1261_v3 }
 0x33d   :  { %v568_v33 = vmax.f32 %v552_v29, 0.0 }
 0x33e   :  { %v574_v34 = vpack.c.bf16 %v570_v31, %v569_v30 }
 0x33f   :  { %v573_v35 = vpack.c.bf16 %v568_v33, %v567_v32  ;;  %1141 = vmatpush3.bf16.msra.mxu1 %v1200_v37 }
 0x340   :  { %1142 = vmatprep.subr.bf16.mxu1 %v1261_v3 }
 0x341   :  { %1122 = vmatprep.mubr.bf16.mxu1 %v573_v35 }
 0x342   :  { %1123 = vmatmul.mubr.bf16.gmra.mrb[12].mxu1 %v574_v34 }
 0x343   :  { %1154 = vmatprep.mubr.msk.bf16.mxu1 %vm1262_vm2, %v1261_v3  ;;  %1143 = vmatpush3.bf16.msra.mxu1 %v1201_v38 }
 0x344   :  { %1144 = vmatprep.subr.bf16.mxu1 %v1261_v3 }
 0x347   :  { %1145 = vmatpush3.bf16.msra.mxu1 %v1202_v39 }
 0x348   :  { %1146 = vmatprep.subr.bf16.mxu1 %v1261_v3 }
 0x34b   :  { %1147 = vmatpush3.bf16.msra.mxu1 %v1203_v40 }
 0x34c   :  { %1148 = vmatprep.subr.bf16.mxu1 %v1261_v3 }
 0x34f   :  { %1149 = vmatpush3.bf16.msra.mxu1 %v1204_v41 }
 0x350   :  { %1150 = vmatprep.subr.bf16.mxu1 %v1261_v3 }
 0x353   :  { %1151 = vmatpush3.bf16.msra.mxu1 %v1205_v42 }
 0x354   :  { %1152 = vmatprep.subr.bf16.mxu1 %v1261_v3 }
 0x357   :  { %1153 = vmatpush3.bf16.msra.mxu1 %v1206_v15 }
 0x40d   :  { %v1120_v45 = vpop.f32.mrb[8].mxu1 }
 0x40e   :  { %v691_v47 = vadd.f32 %v1120_v45, %v947_v44  ;;  %v682_v48 = vpop.f32.mrb[9].mxu1 }
 0x40f   :  { %v683_v49 = vadd.f32 %v947_v44, %v682_v48  ;;  %v1121_v50 = vpop.f32.mrb[10].mxu1 }
 0x410   :  { %v694_v51 = vadd.f32 %v1121_v50, %v947_v44  ;;  %v685_v52 = vpop.f32.mrb[11].mxu1  ;;  %v715_v54 = vmax.f32 %v691_v47, 0.0 }
 0x411   :  { %v686_v53 = vadd.f32 %v947_v44, %v685_v52  ;;  %v713_v56 = vmax.f32 %v683_v49, 0.0 }
 0x412   :  { %v716_v55 = vmax.f32 %v694_v51, 0.0 }
 0x413   :  { %v714_v57 = vmax.f32 %v686_v53, 0.0 }
 0x414   :  { %v740_v58 = vpack.c.bf16 %v716_v55, %v715_v54 }
 0x415   :  { %v739_v59 = vpack.c.bf16 %v714_v57, %v713_v56  ;;  %v1124_v60 = vpop.f32.mrb[12].mxu1 }
 0x416   :  { %v707_v61 = vadd.f32 %v1124_v60, %v947_v44  ;;  %v698_v62 = vpop.f32.mrb[13].mxu1 }
 0x417   :  { %v699_v63 = vadd.f32 %v947_v44, %v698_v62  ;;  %v1125_v0 = vpop.f32.mrb[14].mxu1  ;;  %1127 = vmatpush3.bf16.msra.mxu0 %v739_v59 }
 0x418   :  { %v710_v1 = vadd.f32 %v1125_v0, %v947_v44  ;;  %v701_v2 = vpop.f32.mrb[15].mxu1  ;;  %1128 = vmatprep.subr.bf16.mxu0 %v1261_v3  ;;  %v719_v6 = vmax.f32 %v707_v61, 0.0 }
 0x419   :  { %v702_v4 = vadd.f32 %v947_v44, %v701_v2  ;;  %v717_v9 = vmax.f32 %v699_v63, 0.0 }
 0x41a   :  { %v720_v7 = vmax.f32 %v710_v1, 0.0 }
 0x41b   :  { %v718_v10 = vmax.f32 %v702_v4, 0.0  ;;  %1129 = vmatpush3.bf16.msra.mxu0 %v740_v58 }
 0x41c   :  { %v742_v11 = vpack.c.bf16 %v720_v7, %v719_v6  ;;  %1130 = vmatprep.subr.bf16.mxu0 %v1261_v3 }
 0x41d   :  { %v741_v12 = vpack.c.bf16 %v718_v10, %v717_v9 }
 0x41f   :  { %1131 = vmatpush3.bf16.msra.mxu0 %v741_v12 }
 0x420   :  { %1132 = vmatprep.subr.bf16.mxu0 %v1261_v3 }
 0x423   :  { %1133 = vmatpush3.bf16.msra.mxu0 %v742_v11 }
 0x426   :  { %1135 = vmatmul.mubr.msk.bf16.vlgmr.msra.gmra.mrb[16].mxu0 %vm743_vm3, %v738_v14 }
 0x4f9   :  { %v781_v16 = vpop.f32.mrb[16].mxu0 }
 0x4fa   :  { %v787_v17 = vpack.c.bf16 %v781_v16, %v781_v16  ;;  %v1136_v18 = vpop.f32.mrb[17].mxu0 }
 0x4fb   :  { %v784_v19 = vpop.f32.mrb[18].mxu0 }
 0x4fc   :  { %v1137_v20 = vpop.f32.mrb[19].mxu0  ;;  %1155 = vmatmul.mubr.bf16.vlgmr.msra.gmra.mrb[16].mxu1 %v787_v17 }
 0x5cf   :  { %v893_v3 = vpop.f32.mrb[16].mxu1 }
 0x5d0   :  { %v894_v21 = vadd.f32 %v959_v5, %v893_v3  ;;  %v1156_v22 = vpop.f32.mrb[17].mxu1 }
 0x5d1   :  { %v896_v23 = vpop.f32.mrb[18].mxu1 }
 0x5d2   :  { %899 = vst [vmem:[#allocation5] sm:$0xf] %v894_v21  ;;  %v1157_v24 = vpop.f32.mrb[19].mxu1 }
 0x5d3   :  { %1242 = shalt.err (!%p1239_p12)
}
 0x5d4   :  { %s1243_s7 = scalar_lea.hbm %s1432_s8, 64 }
 0x5d5   :  { %p1244_p13 = scmp.ne.s32.totalorder %s1432_s8, %s1243_s7  ;;  %p1247_p0 = scmp.lt.u32.totalorder %s1243_s7, %s1432_s8 }
 0x5d7   :  { %p1249_p1 = pnand %p1247_p0, %p1244_p13 }
 0x5d9   :  { %1252 = shalt.err (!%p1249_p1)
}
 0x5da   :  { %909 = dma.vmem_to_hbm [thread:$0]  %s907_s2, 64, %s1432_s8, [#allocation4]  }
 0x5db   :  { %1255 = dma.done.wait [#allocation4], 64  }
 0x5dc   :  { %1256 = vsyncadd [#allocation4], 4294967232 }
 0x5dd   :  { %913 = vsyncpa [#allocation3], 1 }
 0x5de   :  { %914 = vsyncpa [#allocation4], 1 }

</bundles_post_ra>
